<compile_context>
chip_gen: v7x
topology: tpu7x:2x2x1
jax: 0.10.0
libtpu: 0.0.40
codegen_flags: <defaults>
</compile_context>

<pallas_src>
import jax
import jax.numpy as jnp
from jax.experimental import pallas as pl
from jax.experimental.pallas import tpu as pltpu


# ----------------------------- helpers --------------------------------------


def _round_up(x, m):
    return ((x + m - 1) // m) * m


def _pad2(a, rows, cols):
    return jnp.pad(a, ((0, rows - a.shape[0]), (0, cols - a.shape[1])))


def _softplus(x):
    # PyTorch Softplus(beta=1, threshold=20): x if x > 20 else log(1 + exp(x))
    return jnp.where(x > 20.0, x, jnp.log1p(jnp.exp(jnp.minimum(x, 20.0))))


def fold_bn(gamma, beta, mean, var, eps=1e-5):
    scale = gamma / jnp.sqrt(var + eps)
    shift = beta - mean * scale
    return scale, shift


# ----------------------- pass 1: fused edge MLP (runs once) -------------------


def edge_mlp_kernel(hcat_ref, w_ref, t_ref, msg_ref):
    # hcat_ref: [E_t, Kp] bf16   w_ref: [Kp, 2Fp] bf16   t_ref: [1, 2Fp] f32
    # msg_ref : [E_t, Fp] bf16
    fp = msg_ref.shape[1]
    z = jnp.dot(hcat_ref[...], w_ref[...], preferred_element_type=jnp.float32)
    z = z + t_ref[...]
    h_mlpt = 1.0 / (1.0 + jnp.exp(-z[:, :fp]))   # exact sigmoid for the message branch
    h_gate = _softplus(z[:, fp:])
    msg_ref[...] = (h_mlpt * h_gate).astype(msg_ref.dtype)


# --------------- pass 2: one-hot scatter-accumulate + node epilogue ----------


def scatter_kernel(fb_ref, lb_ref,               # scalar-prefetch: per-ni edge-block range
                   dst_ref,                      # [E_t, 1]   int32 dst id (-1 = padding)
                   msg_ref,                      # [E_t, Fp]  bf16 per-edge messages
                   sn_ref, tn_ref,               # [Fp, 1]    f32 folded node-BN scale/shift
                   nfeat_t_ref,                  # [Fp, N_t]  f32 residual node features (T)
                   out_ref,                      # [Fp, N_t]  f32 updated node features (T)
                   acc_ref):                     # [Fp, N_t]  f32 VMEM accumulator
    ni = pl.program_id(0)
    ei = pl.program_id(1)
    n_t = out_ref.shape[1]

    @pl.when(ei == 0)
    def _():
        acc_ref[...] = jnp.zeros_like(acc_ref)

    # Only edge blocks fb[ni]..lb[ni] can contain edges destined for this node block
    # (edges are dst-sorted in the wrapper); the index_map clamps, we skip the compute.
    @pl.when(fb_ref[ni] + ei <= lb_ref[ni])
    def _():
        node_row = ni * n_t + jax.lax.broadcasted_iota(jnp.int32, (1, n_t), 1)
        scat_t = (dst_ref[...] == node_row).astype(jnp.bfloat16)          # [E_t, N_t]
        # acc[f, n] += sum_e msg[e, f] * onehot[e, n]  (contract dim 0 of both operands:
        # transposed accumulation -> MXU output width is N_t, not Fp).
        acc_ref[...] += jax.lax.dot_general(
            msg_ref[...], scat_t,
            dimension_numbers=(((0,), (0,)), ((), ())),
            preferred_element_type=jnp.float32)

    @pl.when(ei == pl.num_programs(1) - 1)
    def _():
        y = acc_ref[...] * sn_ref[...] + tn_ref[...] + nfeat_t_ref[...]
        out_ref[...] = pl.reciprocal(1.0 + jnp.exp(-y), approx=True)      # final sigmoid


# ----------------------------- wrapper ---------------------------------------


def conv_func_cgcnn(node_feats, edge_feats, src, dst, params, *, e_tile=1024, n_tile=512):
    """Forward pass of ConvFunc_CGCNN. Returns (updated_node_feats, edge_feats)."""
    N, F = node_feats.shape
    E = edge_feats.shape[0]

    Fp = _round_up(F, 128)          # per-branch output width (lane-dense)
    Kp = _round_up(3 * F, 128)      # contiguous 3F contraction width

    E_t = e_tile if E >= e_tile else _round_up(max(E, 1), 8)
    E_pad = _round_up(E, E_t)
    if N >= 256:
        # keep >= 2 lane-dense N blocks so v7x's two TensorCores both get work
        N_t = min(n_tile, _round_up(-(-N // 2), 128))
    else:
        N_t = _round_up(max(N, 1), 8)
    N_pad = _round_up(N, N_t)
    num_nb = N_pad // N_t
    num_eb = E_pad // E_t
    vmem_limit = 48 * 1024 * 1024   # safe on v7x (64 MiB physical) and generous on v5e/v6e

    # --- parameters: fold BN into the Linear, fuse the two branches, pad lane-dense ---
    def prep(w, b, bn):
        s, t = fold_bn(*bn)
        w_f = w * s[None, :]                       # BN scale folded into weights
        t_f = b * s + t                            # Linear bias folded into BN shift
        return _pad2(w_f, Kp, Fp), jnp.pad(t_f, (0, Fp - F))

    w1p, t1p = prep(params["w_mlpt"], params["b_mlpt"], params["bn_mlpt"])
    w2p, t2p = prep(params["w_gate"], params["b_gate"], params["bn_gate"])
    w12 = jnp.concatenate([w1p, w2p], axis=1).astype(jnp.bfloat16)     # [Kp, 2Fp]
    t12 = jnp.concatenate([t1p, t2p]).reshape(1, 2 * Fp)               # [1, 2Fp] f32

    sn, tn = fold_bn(*params["bn_node"])
    sn_col = jnp.pad(sn, (0, Fp - F)).reshape(Fp, 1)
    tn_col = jnp.pad(tn, (0, Fp - F)).reshape(Fp, 1)

    # --- sort edges by destination: per-node-block edge ranges become contiguous ---
    dst = dst.astype(jnp.int32)
    order = jnp.argsort(dst)
    src_s, dst_s, edge_s = src[order], dst[order], edge_feats[order]

    # --- glue: per-edge gather + one contiguous 3F concat (bf16 MXU operand) ---
    h_cat = jnp.concatenate([node_feats[src_s], node_feats[dst_s], edge_s], axis=1)
    h_cat = _pad2(h_cat, E_pad, Kp).astype(jnp.bfloat16)               # [E_pad, Kp]

    # --- pass 1: edge MLP, once per edge block ---
    msg = pl.pallas_call(
        edge_mlp_kernel,
        out_shape=jax.ShapeDtypeStruct((E_pad, Fp), jnp.bfloat16),
        grid_spec=pltpu.PrefetchScalarGridSpec(
            num_scalar_prefetch=0,
            grid=(num_eb,),
            in_specs=[
                pl.BlockSpec((E_t, Kp), lambda ei: (ei, 0)),
                pl.BlockSpec((Kp, 2 * Fp), lambda ei: (0, 0)),
                pl.BlockSpec((1, 2 * Fp), lambda ei: (0, 0)),
            ],
            out_specs=pl.BlockSpec((E_t, Fp), lambda ei: (ei, 0)),
        ),
        compiler_params=pltpu.CompilerParams(
            dimension_semantics=("parallel",),
            vmem_limit_bytes=vmem_limit,
        ),
    )(h_cat, w12, t12)

    # --- pass 2 schedule: per node block, first/last edge block containing its edges ---
    bounds = jnp.searchsorted(
        dst_s, jnp.arange(num_nb + 1, dtype=jnp.int32) * N_t).astype(jnp.int32)
    first_edge, last_excl = bounds[:-1], bounds[1:]
    first_blk = jnp.minimum(first_edge // E_t, num_eb - 1).astype(jnp.int32)
    last_blk = jnp.where(last_excl > first_edge, (last_excl - 1) // E_t, first_blk)
    last_blk = jnp.clip(last_blk, 0, num_eb - 1).astype(jnp.int32)

    dst_col = jnp.full((E_pad, 1), -1, jnp.int32).at[:E, 0].set(dst_s)
    nfeat_t = _pad2(node_feats, N_pad, Fp).T                           # [Fp, N_pad] f32

    def edge_block_map(ni, ei, fb, lb):
        # Clamp: once past this node block's range the index stops changing (no re-DMA);
        # the kernel pl.when-skips the compute for those steps.
        return (jnp.minimum(fb[ni] + ei, lb[ni]), 0)

    out_t = pl.pallas_call(
        scatter_kernel,
        out_shape=jax.ShapeDtypeStruct((Fp, N_pad), jnp.float32),
        grid_spec=pltpu.PrefetchScalarGridSpec(
            num_scalar_prefetch=2,
            grid=(num_nb, num_eb),
            in_specs=[
                pl.BlockSpec((E_t, 1), edge_block_map),                       # dst ids
                pl.BlockSpec((E_t, Fp), edge_block_map),                      # messages
                pl.BlockSpec((Fp, 1), lambda ni, ei, fb, lb: (0, 0)),         # node BN scale
                pl.BlockSpec((Fp, 1), lambda ni, ei, fb, lb: (0, 0)),         # node BN shift
                pl.BlockSpec((Fp, N_t), lambda ni, ei, fb, lb: (0, ni)),      # residual (T)
            ],
            out_specs=pl.BlockSpec((Fp, N_t), lambda ni, ei, fb, lb: (0, ni)),
            scratch_shapes=[pltpu.VMEM((Fp, N_t), jnp.float32)],
        ),
        compiler_params=pltpu.CompilerParams(
            dimension_semantics=("parallel", "arbitrary"),
            vmem_limit_bytes=vmem_limit,
        ),
    )(first_blk, last_blk, dst_col, msg, sn_col, tn_col, nfeat_t)

    return out_t[:F, :N].T, edge_feats


# ----------------------------- pure-JAX reference ----------------------------


def reference_forward(node_feats, edge_feats, src, dst, params):
    """Pure-JAX f32 reference (mirrors the PyTorch/DGL forward in eval mode)."""
    h_cat = jnp.concatenate([node_feats[src], node_feats[dst], edge_feats], axis=1)

    def mlp(x, w, b, bn, act):
        s, t = fold_bn(*bn)
        return act(((x @ w) + b.reshape(1, -1)) * s.reshape(1, -1) + t.reshape(1, -1))

    h_mlpt = mlp(h_cat, params["w_mlpt"], params["b_mlpt"], params["bn_mlpt"], jax.nn.sigmoid)
    h_gate = mlp(h_cat, params["w_gate"], params["b_gate"], params["bn_gate"], _softplus)
    msg = h_mlpt * h_gate
    N = node_feats.shape[0]
    agg = jax.ops.segment_sum(msg, dst, num_segments=N)
    sn, tn = fold_bn(*params["bn_node"])
    return jax.nn.sigmoid(agg * sn.reshape(1, -1) + tn.reshape(1, -1) + node_feats), edge_feats


# ----------------------------- test harness ----------------------------------


def _make_inputs(key, N, E, F):
    keys = jax.random.split(key, 12)
    node_feats = jax.random.normal(keys[0], (N, F), dtype=jnp.float32)
    edge_feats = jax.random.normal(keys[1], (E, F), dtype=jnp.float32)
    src = jax.random.randint(keys[2], (E,), 0, N)
    dst = jax.random.randint(keys[3], (E,), 0, N)

    def bn_params(k, f):
        k1, k2, k3 = jax.random.split(k, 3)
        gamma = 1.0 + 0.1 * jax.random.normal(k1, (f,), jnp.float32)
        beta = 0.1 * jax.random.normal(k2, (f,), jnp.float32)
        mean = 0.1 * jax.random.normal(k3, (f,), jnp.float32)
        var = jnp.ones((f,), jnp.float32) * 0.9
        return (gamma, beta, mean, var)

    params = {
        # nn.Linear(3F, F): y = x @ W.T + b; stored pre-transposed as [3F, F]
        "w_mlpt": 0.1 * jax.random.normal(keys[4], (3 * F, F), jnp.float32),
        "b_mlpt": 0.1 * jax.random.normal(keys[5], (F,), jnp.float32),
        "w_gate": 0.1 * jax.random.normal(keys[6], (3 * F, F), jnp.float32),
        "b_gate": 0.1 * jax.random.normal(keys[7], (F,), jnp.float32),
        "bn_mlpt": bn_params(keys[8], F),
        "bn_gate": bn_params(keys[9], F),
        "bn_node": bn_params(keys[10], F),
    }
    return node_feats, edge_feats, src, dst, params


if __name__ == "__main__":
    key = jax.random.PRNGKey(0)
    k1, k2 = jax.random.split(key)

    # Small single-block case (matches the module's typical tiny graph).
    node_feats, edge_feats, src, dst, params = _make_inputs(k1, N=16, E=32, F=32)
    out_nodes, out_edges = conv_func_cgcnn(node_feats, edge_feats, src, dst, params)
    out_nodes = jax.block_until_ready(out_nodes)
    ref_nodes, _ = reference_forward(node_feats, edge_feats, src, dst, params)
    assert jnp.allclose(out_nodes, ref_nodes, atol=2e-2, rtol=2e-2), "mismatch (small case)"
    assert out_nodes.shape == (16, 32) and out_edges.shape == (32, 32)

    # Multi-block case: exercises the dst-sorted scalar-prefetch scheduling and the
    # transposed accumulation across several edge blocks and two node blocks.
    node_feats2, edge_feats2, src2, dst2, params2 = _make_inputs(k2, N=300, E=1024, F=32)
    out_nodes2, _ = conv_func_cgcnn(node_feats2, edge_feats2, src2, dst2, params2,
                                    e_tile=256, n_tile=512)
    out_nodes2 = jax.block_until_ready(out_nodes2)
    ref_nodes2, _ = reference_forward(node_feats2, edge_feats2, src2, dst2, params2)
    assert jnp.allclose(out_nodes2, ref_nodes2, atol=2e-2, rtol=2e-2), "mismatch (multi-block)"
    assert out_nodes2.shape == (300, 32)

    print("KERNEL_OK")
</pallas_src>

<mosaic_0001>
module attributes {stable_mosaic.version = 11 : i64} {
  func.func @edge_mlp_kernel(%arg0: i32, %arg1: memref<32x128xbf16, #tpu.memory_space<vmem>>, %arg2: memref<128x256xbf16, #tpu.memory_space<vmem>>, %arg3: memref<1x256xf32, #tpu.memory_space<vmem>>, %arg4: memref<32x128xbf16, #tpu.memory_space<vmem>>) attributes {dimension_semantics = [#tpu.dimension_semantics<parallel>], iteration_bounds = array<i64: 1>, scalar_prefetch = 0 : i64, scratch_operands = 0 : i64, tpu.core_type = #tpu.core_type<tc>, window_params = [{transform_indices = @transform_0, window_bounds = array<i64: 32, 128>}, {pipeline_mode = #tpu.pipeline_mode<synchronous>, transform_indices = @transform_1, window_bounds = array<i64: 128, 256>}, {pipeline_mode = #tpu.pipeline_mode<synchronous>, transform_indices = @transform_2, window_bounds = array<i64: 1, 256>}, {transform_indices = @transform_3, window_bounds = array<i64: 32, 128>}]} {
    %c0 = arith.constant 0 : index
    %c0_0 = arith.constant 0 : index
    %0 = vector.load %arg1[%c0, %c0_0] : memref<32x128xbf16, #tpu.memory_space<vmem>>, vector<32x128xbf16>
    %c0_1 = arith.constant 0 : index
    %c0_2 = arith.constant 0 : index
    %1 = vector.load %arg2[%c0_1, %c0_2] : memref<128x256xbf16, #tpu.memory_space<vmem>>, vector<128x256xbf16>
    %cst = arith.constant dense<0.000000e+00> : vector<32x256xf32>
    %2 = tpu.matmul %0, %1, %cst {dimension_numbers = #tpu.dot_dimension_numbers<[1], [0], [0], [1], [0, 0, 1, 1], [], []>} : vector<32x128xbf16>, vector<128x256xbf16>, vector<32x256xf32> -> vector<32x256xf32>
    %c0_3 = arith.constant 0 : index
    %c0_4 = arith.constant 0 : index
    %3 = vector.load %arg3[%c0_3, %c0_4] : memref<1x256xf32, #tpu.memory_space<vmem>>, vector<1x256xf32>
    %4 = vector.broadcast %3 : vector<1x256xf32> to vector<32x256xf32>
    %5 = arith.addf %2, %4 : vector<32x256xf32>
    %6 = vector.extract_strided_slice %5 {offsets = [0, 0], sizes = [32, 128], strides = [1, 1]} : vector<32x256xf32> to vector<32x128xf32>
    %cst_5 = arith.constant 0.000000e+00 : f32
    %7 = vector.broadcast %cst_5 : f32 to vector<32x128xf32>
    %8 = arith.subf %7, %6 : vector<32x128xf32>
    %9 = math.exp %8 : vector<32x128xf32>
    %cst_6 = arith.constant 1.000000e+00 : f32
    %10 = vector.broadcast %cst_6 : f32 to vector<32x128xf32>
    %11 = arith.addf %10, %9 : vector<32x128xf32>
    %cst_7 = arith.constant 1.000000e+00 : f32
    %12 = vector.broadcast %cst_7 : f32 to vector<32x128xf32>
    %13 = arith.divf %12, %11 : vector<32x128xf32>
    %14 = vector.extract_strided_slice %5 {offsets = [0, 128], sizes = [32, 128], strides = [1, 1]} : vector<32x256xf32> to vector<32x128xf32>
    %cst_8 = arith.constant 2.000000e+01 : f32
    %15 = vector.broadcast %cst_8 : f32 to vector<32x128xf32>
    %16 = arith.cmpf ogt, %14, %15 : vector<32x128xf32>
    %cst_9 = arith.constant 2.000000e+01 : f32
    %17 = vector.broadcast %cst_9 : f32 to vector<32x128xf32>
    %18 = arith.minimumf %14, %17 : vector<32x128xf32>
    %19 = math.exp %18 : vector<32x128xf32>
    %20 = math.log1p %19 : vector<32x128xf32>
    %21 = arith.select %16, %14, %20 : vector<32x128xi1>, vector<32x128xf32>
    %22 = arith.mulf %13, %21 : vector<32x128xf32>
    %23 = arith.truncf %22 : vector<32x128xf32> to vector<32x128xbf16>
    %c0_10 = arith.constant 0 : index
    %c0_11 = arith.constant 0 : index
    %24 = vector.load %arg4[%c0_10, %c0_11] : memref<32x128xbf16, #tpu.memory_space<vmem>>, vector<32x128xbf16>
    tpu.vector_store %arg4[%c0_10, %c0_11], %23 {strides = array<i32>} : memref<32x128xbf16, #tpu.memory_space<vmem>>, vector<32x128xbf16>,
    return
  }
  func.func @transform_0(%arg0: i32) -> (i32, i32) {
    %c0_i32 = arith.constant 0 : i32
    %c0_i32_0 = arith.constant 0 : i32
    return %arg0, %c0_i32 : i32, i32
  }
  func.func @transform_1(%arg0: i32) -> (i32, i32) {
    %c0_i32 = arith.constant 0 : i32
    %c0_i32_0 = arith.constant 0 : i32
    %c0_i32_1 = arith.constant 0 : i32
    return %c0_i32, %c0_i32_0 : i32, i32
  }
  func.func @transform_2(%arg0: i32) -> (i32, i32) {
    %c0_i32 = arith.constant 0 : i32
    %c0_i32_0 = arith.constant 0 : i32
    %c0_i32_1 = arith.constant 0 : i32
    return %c0_i32, %c0_i32_0 : i32, i32
  }
  func.func @transform_3(%arg0: i32) -> (i32, i32) {
    %c0_i32 = arith.constant 0 : i32
    %c0_i32_0 = arith.constant 0 : i32
    return %arg0, %c0_i32 : i32, i32
  }
}

</mosaic_0001>

<bundles_post_ra>
// kernel: tpu_custom_call.1
= control target key start
LH: loop header
LB: loop body
LE: loop exit
PB: predicated region body
PF: predicated region fallthrough
CT: control target
= control target key end

     0   :  { %8 = vsyncpa [#allocation3], 0  ;;  %s627_s0 = inlined_call_operand.hbm [shape: bf16[32,128], index: 0, kind: input, shape index: {}]   ;;  %s628_s1 = inlined_call_operand.hbm [shape: bf16[128,256], index: 1, kind: input, shape index: {}]   ;;  %s629_s2 = inlined_call_operand.vmem [shape: f32[1,256], index: 2, kind: input, shape index: {}]   ;;  %s630_s3 = inlined_call_operand.hbm [shape: bf16[32,128], index: 3, kind: output, shape index: {}]  }
   0x1   :  { %9 = vsyncpa [#allocation6], 0 }
   0x2   :  { %10 = vsyncpa [#allocation4], 0  ;;  %s534_s12 = smov [#allocation2]   ;;  %s462_s16 = scalar_lea.hbm %s627_s0, 256 }
   0x3   :  { %s16_s13 = sshll.u32 %s534_s12, 4  ;;  %p463_p0 = scmp.ne.s32.totalorder %s627_s0, %s462_s16  ;;  %s17_s13 = int_to_ptr.vmem [resolvable:$true] %s16_s13 }
   0x4   :  { %p466_p1 = scmp.lt.u32.totalorder %s462_s16, %s627_s0 }
   0x6   :  { %p468_p2 = pnand %p466_p1, %p463_p0 }
   0x8   :  { %471 = shalt.err (!%p468_p2)
}
   0x9   :  { %s472_s21 = scalar_lea.vmem %s17_s13, 256  ;;  %p477_p4 = scmp.lt.s32.totalorder %s17_s13, %s17_s13 }
   0xa   :  { %p473_p3 = scmp.ne.s32.totalorder %s17_s13, %s472_s21  ;;  %p478_p5 = scmp.lt.s32.totalorder %s472_s21, %s472_s21 }
   0xc   :  { %p479_p6 = por %p478_p5, %p477_p4 }
   0xe   :  { %p480_p7 = pnand %p479_p6, %p473_p3 }
  0x10   :  { %483 = shalt.err (!%p480_p7)
}
  0x11   :  { %s535_s22 = smov 64   ;;  %s536_s23 = smov 4  }
  0x12   :  { %22 = dma.hbm_to_vmem [thread:$0]  %s627_s0, 256, %s17_s13, [#allocation3], %s535_s22, %s535_s22, %s536_s23  }
  0x13   :  { %s537_s26 = smov [#allocation5]   ;;  %s484_s30 = scalar_lea.hbm %s628_s1, 2048 }
  0x14   :  { %s28_s27 = sshll.u32 %s537_s26, 4  ;;  %p485_p8 = scmp.ne.s32.totalorder %s628_s1, %s484_s30  ;;  %s29_s27 = int_to_ptr.vmem [resolvable:$true] %s28_s27 }
  0x15   :  { %p488_p9 = scmp.lt.u32.totalorder %s484_s30, %s628_s1 }
  0x17   :  { %p490_p10 = pnand %p488_p9, %p485_p8 }
  0x19   :  { %493 = shalt.err (!%p490_p10)
}
  0x1a   :  { %s494_s8 = scalar_lea.vmem %s29_s27, 2048  ;;  %p499_p12 = scmp.lt.s32.totalorder %s29_s27, %s29_s27 }
  0x1b   :  { %p495_p11 = scmp.ne.s32.totalorder %s29_s27, %s494_s8  ;;  %p500_p13 = scmp.lt.s32.totalorder %s494_s8, %s494_s8 }
  0x1d   :  { %p501_p0 = por %p500_p13, %p499_p12 }
  0x1f   :  { %p502_p1 = pnand %p501_p0, %p495_p11 }
  0x21   :  { %505 = shalt.err (!%p502_p1)
}
  0x22   :  { %s538_s0 = smov 128   ;;  %s539_s9 = smov 8  }
  0x23   :  { %34 = dma.hbm_to_vmem [thread:$0]  %s628_s1, 2048, %s29_s27, [#allocation6], %s538_s0, %s538_s0, %s539_s9  }
  0x24   :  { %528 = dma.done.wait [#allocation3], 256  }
  0x25   :  { %529 = vsyncadd [#allocation3], 4294967040 }
  0x26   :  { %530 = dma.done.wait [#allocation6], 2048  }
  0x27   :  { %531 = vsyncadd [#allocation6], 4294965248  ;;  %v540_v0 = vmov 0   ;;  %v404_v1 = vld [vmem:[#allocation5 + $0x4] ss:$8 sps:$4 sm:$0xff]   ;;  %v428_v17 = vld [vmem:[#allocation2] sm:$0xff]   ;;  %v66_v19 = vlaneseq }
  0x28   :  { %200 = vmatprep.mubr.bf16.mxu0 %v540_v0  ;;  %210 = vmatprep.mubr.bf16.mxu1 %v540_v0  ;;  %v406_v2 = vld [vmem:[#allocation5] ss:$8 sps:$4 sm:$0xff]   ;;  %v407_v3 = vld [vmem:[#allocation5 + $0x14] ss:$8 sps:$4 sm:$0xff]   ;;  %v409_v4 = vld [vmem:[#allocation5 + $0x10] ss:$8 sps:$4 sm:$0xff]  }
  0x29   :  { %168 = vmatprep.subr.bf16.mxu0 %v404_v1  ;;  %380 = vmatprep.subr.bf16.mxu1 %v404_v1  ;;  %v410_v5 = vld [vmem:[#allocation5 + $0x24] ss:$8 sps:$4 sm:$0xff]   ;;  %v412_v6 = vld [vmem:[#allocation5 + $0x20] ss:$8 sps:$4 sm:$0xff]   ;;  %v413_v7 = vld [vmem:[#allocation5 + $0x34] ss:$8 sps:$4 sm:$0xff]  }
  0x2a   :  { %169 = vmatpush1.bf16.msra.mxu0 %v406_v2  ;;  %388 = vmatpush1.bf16.msra.mxu1 %v406_v2  ;;  %v415_v8 = vld [vmem:[#allocation5 + $0x30] ss:$8 sps:$4 sm:$0xff]   ;;  %v416_v9 = vld [vmem:[#allocation5 + $0x44] ss:$8 sps:$4 sm:$0xff]   ;;  %v418_v10 = vld [vmem:[#allocation5 + $0x40] ss:$8 sps:$4 sm:$0xff]  }
  0x2b   :  { %170 = vmatprep.subr.bf16.mxu0 %v407_v3  ;;  %381 = vmatprep.subr.bf16.mxu1 %v407_v3  ;;  %v419_v11 = vld [vmem:[#allocation5 + $0x54] ss:$8 sps:$4 sm:$0xff]   ;;  %v421_v12 = vld [vmem:[#allocation5 + $0x50] ss:$8 sps:$4 sm:$0xff]   ;;  %v422_v13 = vld [vmem:[#allocation5 + $0x64] ss:$8 sps:$4 sm:$0xff]  }
  0x2c   :  { %v424_v14 = vld [vmem:[#allocation5 + $0x60] ss:$8 sps:$4 sm:$0xff]   ;;  %v425_v15 = vld [vmem:[#allocation5 + $0x74] ss:$8 sps:$4 sm:$0xff]   ;;  %v427_v16 = vld [vmem:[#allocation5 + $0x70] ss:$8 sps:$4 sm:$0xff]  }
  0x2d   :  { %v429_v18 = vld [vmem:[#allocation2 + $0x8] sm:$0xff]   ;;  %v67_v20 = vshrl.u32 %v66_v19, 7  ;;  %v64_v22 = vld [vmem:[%s629_s2] sm:$0x3]  ;;  %s541_s2 = smov [#allocation7]  }
  0x2e   :  { %171 = vmatpush1.bf16.msra.mxu0 %v409_v4  ;;  %389 = vmatpush1.bf16.msra.mxu1 %v409_v4  ;;  %s330_s13 = sshll.u32 %s541_s2, 4  ;;  %s331_s13 = int_to_ptr.vmem [resolvable:$true] %s330_s13 }
  0x2f   :  { %172 = vmatprep.subr.bf16.mxu0 %v410_v5  ;;  %382 = vmatprep.subr.bf16.mxu1 %v410_v5  ;;  %v68_v21 = vsub.s32 0, %v67_v20  ;;  %v72_v23 = vsub.s32 1, %v67_v20  ;;  %s506_s14 = scalar_lea.vmem %s331_s13, 256  ;;  %p511_p3 = scmp.lt.s32.totalorder %s331_s13, %s331_s13 }
  0x30   :  { %p507_p2 = scmp.ne.s32.totalorder %s331_s13, %s506_s14  ;;  %p512_p4 = scmp.lt.s32.totalorder %s506_s14, %s506_s14 }
  0x31   :  { %v69_v24 = vrot.slane %v64_v22, %v68_v21  ;;  %v73_v25 = vrot.slane %v64_v22, %v72_v23 }
  0x32   :  { %173 = vmatpush1.bf16.msra.mxu0 %v412_v6  ;;  %390 = vmatpush1.bf16.msra.mxu1 %v412_v6  ;;  %p513_p5 = por %p512_p4, %p511_p3 }
  0x33   :  { %174 = vmatprep.subr.bf16.mxu0 %v413_v7  ;;  %383 = vmatprep.subr.bf16.mxu1 %v413_v7 }
  0x34   :  { %p514_p6 = pnand %p513_p5, %p507_p2 }
  0x36   :  { %175 = vmatpush1.bf16.msra.mxu0 %v415_v8  ;;  %391 = vmatpush1.bf16.msra.mxu1 %v415_v8 }
  0x37   :  { %176 = vmatprep.subr.bf16.mxu0 %v416_v9  ;;  %384 = vmatprep.subr.bf16.mxu1 %v416_v9 }
  0x3a   :  { %177 = vmatpush1.bf16.msra.mxu0 %v418_v10  ;;  %392 = vmatpush1.bf16.msra.mxu1 %v418_v10 }
  0x3b   :  { %178 = vmatprep.subr.bf16.mxu0 %v419_v11  ;;  %385 = vmatprep.subr.bf16.mxu1 %v419_v11 }
  0x3e   :  { %179 = vmatpush1.bf16.msra.mxu0 %v421_v12  ;;  %393 = vmatpush1.bf16.msra.mxu1 %v421_v12 }
  0x3f   :  { %180 = vmatprep.subr.bf16.mxu0 %v422_v13  ;;  %386 = vmatprep.subr.bf16.mxu1 %v422_v13 }
  0x42   :  { %181 = vmatpush1.bf16.msra.mxu0 %v424_v14  ;;  %394 = vmatpush1.bf16.msra.mxu1 %v424_v14 }
  0x43   :  { %182 = vmatprep.subr.bf16.mxu0 %v425_v15  ;;  %387 = vmatprep.subr.bf16.mxu1 %v425_v15 }
  0x46   :  { %183 = vmatpush1.bf16.msra.mxu0 %v427_v16  ;;  %395 = vmatpush1.bf16.msra.mxu1 %v427_v16 }
  0x49   :  { %201 = vmatmul.mubr.bf16.vlgmr.msra.gmra.mrb[0].mxu0 %v428_v17  ;;  %211 = vmatmul.mubr.bf16.vlgmr.msra.gmra.mrb[0].mxu1 %v429_v18 }
 0x11c   :  { %v202_v26 = vpop.f32.mrb[0].mxu0  ;;  %v212_v27 = vpop.f32.mrb[0].mxu1 }
 0x11d   :  { %v203_v28 = vadd.f32 %v202_v26, %v69_v24  ;;  %v213_v29 = vadd.f32 %v212_v27, %v69_v24  ;;  %v204_v30 = vpop.f32.mrb[1].mxu0  ;;  %v214_v31 = vpop.f32.mrb[1].mxu1 }
 0x11e   :  { %v592_v32 = vadd.f32 %v204_v30, %v73_v25  ;;  %v594_v33 = vadd.f32 %v214_v31, %v73_v25  ;;  %v206_v34 = vpop.f32.mrb[2].mxu0  ;;  %v216_v35 = vpop.f32.mrb[2].mxu1 }
 0x11f   :  { %v221_v36 = vsub.f32 0.0, %v203_v28  ;;  %v223_v37 = vsub.f32 0.0, %v213_v29  ;;  %v207_v38 = vadd.f32 %v206_v34, %v69_v24  ;;  %v217_v39 = vadd.f32 %v216_v35, %v69_v24  ;;  %v208_v40 = vpop.f32.mrb[3].mxu0  ;;  %v218_v41 = vpop.f32.mrb[3].mxu1 }
 0x120   :  { %v249_v42 = vmin.f32 %v592_v32, 20.0  ;;  %v251_v43 = vmin.f32 %v594_v33, 20.0  ;;  %v598_v50 = vadd.f32 %v208_v40, %v73_v25  ;;  %v600_v51 = vadd.f32 %v218_v41, %v73_v25 }
 0x121   :  { %v225_v44 = vmul.f32 1.442695, %v221_v36  ;;  %v229_v45 = vmul.f32 1.442695, %v223_v37  ;;  %v222_v46 = vsub.f32 0.0, %v207_v38  ;;  %v224_v47 = vsub.f32 0.0, %v217_v39 }
 0x122   :  { %v253_v48 = vmul.f32 1.442695, %v249_v42  ;;  %v257_v49 = vmul.f32 1.442695, %v251_v43  ;;  %v250_v54 = vmin.f32 %v598_v50, 20.0  ;;  %v252_v55 = vmin.f32 %v600_v51, 20.0 }
 0x123   :  { %430 = vpow2.f32 %v225_v44  ;;  %v227_v52 = vmul.f32 1.442695, %v222_v46  ;;  %v231_v53 = vmul.f32 1.442695, %v224_v47  ;;  %vm245_vm1 = vcmp.gt.f32.partialorder %v592_v32, 20.0 }
 0x124   :  { %432 = vpow2.f32 %v229_v45  ;;  %v255_v56 = vmul.f32 1.442695, %v250_v54  ;;  %v259_v57 = vmul.f32 1.442695, %v252_v55  ;;  %vm247_vm3 = vcmp.gt.f32.partialorder %v594_v33, 20.0 }
 0x125   :  { %434 = vpow2.f32 %v253_v48  ;;  %vm246_vm5 = vcmp.gt.f32.partialorder %v598_v50, 20.0  ;;  %vm248_vm7 = vcmp.gt.f32.partialorder %v600_v51, 20.0 }
 0x126   :  { %436 = vpow2.f32 %v257_v49 }
 0x127   :  { %438 = vpow2.f32 %v227_v52 }
 0x128   :  { %440 = vpow2.f32 %v231_v53 }
 0x129   :  { %442 = vpow2.f32 %v255_v56 }
 0x12a   :  { %444 = vpow2.f32 %v259_v57 }
 0x12d   :  { %v431_v58 = vpop.eup %430 }
 0x12e   :  { %v433_v59 = vpop.eup %432  ;;  %v233_v62 = vadd.f32 1.0, %v431_v58 }
 0x12f   :  { %v435_v60 = vpop.eup %434  ;;  %v235_v1 = vadd.f32 1.0, %v433_v59 }
 0x130   :  { %v437_v61 = vpop.eup %436  ;;  %v261_v63 = vadd.f32 1.0, %v435_v60  ;;  %v264_v7 = vmul.f32 -0.5, %v435_v60  ;;  %v267_v13 = vand.u32 2147483647, %v435_v60 }
 0x131   :  { %v439_v0 = vpop.eup %438  ;;  %v279_v2 = vadd.f32 1.0, %v437_v61  ;;  %v282_v9 = vmul.f32 -0.5, %v437_v61  ;;  %v285_v17 = vand.u32 2147483647, %v437_v61 }
 0x132   :  { %v441_v3 = vpop.eup %440  ;;  %446 = vlog2.f32 %v261_v63  ;;  %v234_v10 = vadd.f32 1.0, %v439_v0  ;;  %v265_v12 = vadd.f32 1.0, %v264_v7  ;;  %vm268_vm0 = vcmp.lt.f32.partialorder %v267_v13, 0.0004427343 }
 0x133   :  { %v443_v4 = vpop.eup %442  ;;  %448 = vlog2.f32 %v279_v2  ;;  %v236_v11 = vadd.f32 1.0, %v441_v3  ;;  %v283_v15 = vadd.f32 1.0, %v282_v9  ;;  %vm286_vm2 = vcmp.lt.f32.partialorder %v285_v17, 0.0004427343 }
 0x134   :  { %v445_v5 = vpop.eup %444  ;;  %450 = vrcp.f32 %v233_v62  ;;  %v270_v6 = vadd.f32 1.0, %v443_v4  ;;  %v273_v14 = vmul.f32 -0.5, %v443_v4  ;;  %v266_v21 = vmul.f32 %v435_v60, %v265_v12 }
 0x135   :  { %452 = vrcp.f32 %v235_v1  ;;  %v288_v8 = vadd.f32 1.0, %v445_v5  ;;  %v291_v16 = vmul.f32 -0.5, %v445_v5  ;;  %v284_v25 = vmul.f32 %v437_v61, %v283_v15 }
 0x136   :  { %454 = vlog2.f32 %v270_v6  ;;  %v274_v22 = vadd.f32 1.0, %v273_v14  ;;  %v276_v26 = vand.u32 2147483647, %v443_v4  ;;  %v294_v30 = vand.u32 2147483647, %v445_v5 }
 0x137   :  { %456 = vlog2.f32 %v288_v8  ;;  %v292_v27 = vadd.f32 1.0, %v291_v16 }
 0x138   :  { %458 = vrcp.f32 %v234_v10  ;;  %v275_v40 = vmul.f32 %v443_v4, %v274_v22  ;;  %vm277_vm4 = vcmp.lt.f32.partialorder %v276_v26, 0.0004427343  ;;  %vm295_vm6 = vcmp.lt.f32.partialorder %v294_v30, 0.0004427343 }
 0x139   :  { %460 = vrcp.f32 %v236_v11  ;;  %v293_v43 = vmul.f32 %v445_v5, %v292_v27 }
 0x13c   :  { %v447_v18 = vpop.eup %446 }
 0x13d   :  { %v449_v19 = vpop.eup %448  ;;  %v263_v20 = vmul.f32 0.6931472, %v447_v18 }
 0x13e   :  { %v451_v23 = vpop.eup %450  ;;  %v281_v24 = vmul.f32 0.6931472, %v449_v19 }
 0x13f   :  { %v453_v28 = vpop.eup %452  ;;  %v269_v29 = vsel %vm268_vm0, %v266_v21, %v263_v20 }
 0x140   :  { %v455_v31 = vpop.eup %454  ;;  %v297_v34 = vsel %vm245_vm1, %v592_v32, %v269_v29  ;;  %v287_v35 = vsel %vm286_vm2, %v284_v25, %v281_v24 }
 0x141   :  { %v457_v36 = vpop.eup %456  ;;  %v301_v37 = vmul.f32 %v451_v23, %v297_v34  ;;  %v299_v38 = vsel %vm247_vm3, %v594_v33, %v287_v35  ;;  %v272_v39 = vmul.f32 0.6931472, %v455_v31 }
 0x142   :  { %v303_v41 = vmul.f32 %v453_v28, %v299_v38  ;;  %v290_v42 = vmul.f32 0.6931472, %v457_v36  ;;  %v459_v45 = vpop.eup %458 }
 0x143   :  { %v278_v44 = vsel %vm277_vm4, %v275_v40, %v272_v39  ;;  %v461_v47 = vpop.eup %460 }
 0x144   :  { %v298_v32 = vsel %vm246_vm5, %v598_v50, %v278_v44  ;;  %v296_v46 = vsel %vm295_vm6, %v293_v43, %v290_v42 }
 0x145   :  { %v302_v48 = vmul.f32 %v459_v45, %v298_v32  ;;  %v300_v33 = vsel %vm248_vm7, %v600_v51, %v296_v46 }
 0x146   :  { %v304_v49 = vmul.f32 %v461_v47, %v300_v33 }
 0x147   :  { %v372_v52 = vpack.c.bf16 %v302_v48, %v301_v37 }
 0x148   :  { %v377_v53 = vpack.c.bf16 %v304_v49, %v303_v41 }
 0x149   :  { %373 = vst [vmem:[#allocation7] sm:$0xff] %v372_v52  }
 0x14a   :  { %379 = vst [vmem:[#allocation7 + $0x8] sm:$0xff] %v377_v53  }
 0x14b   :  { %517 = shalt.err (!%p514_p6)
}
 0x14c   :  { %s518_s17 = scalar_lea.hbm %s630_s3, 256 }
 0x14d   :  { %p519_p7 = scmp.ne.s32.totalorder %s630_s3, %s518_s17  ;;  %p522_p8 = scmp.lt.u32.totalorder %s518_s17, %s630_s3 }
 0x14f   :  { %p524_p9 = pnand %p522_p8, %p519_p7 }
 0x151   :  { %527 = shalt.err (!%p524_p9)
}
 0x152   :  { %336 = dma.vmem_to_hbm [thread:$0]  %s331_s13, 256, %s630_s3, [#allocation4], %s535_s22, %s535_s22, %s536_s23  }
 0x153   :  { %532 = dma.done.wait [#allocation4], 256  }
 0x154   :  { %533 = vsyncadd [#allocation4], 4294967040 }
 0x155   :  { %340 = vsyncpa [#allocation3], 1 }
 0x156   :  { %341 = vsyncpa [#allocation6], 1 }
 0x157   :  { %342 = vsyncpa [#allocation4], 1 }

</bundles_post_ra>
